<compile_context>
chip_gen: v5e
topology: v5e:2x2
jax: 0.10.0
libtpu: 0.0.40
codegen_flags: <defaults>
</compile_context>

<pallas_src>
import jax
import jax.numpy as jnp
from jax.experimental import pallas as pl
from jax.experimental.pallas import tpu as pltpu

_LANE = 128


def _fpool_kernel(f_ref, z_ref, o_ref, h_ref):
    # h_ref: (r_tile, 128) f32 running state; persists across the seq-chunk
    # grid axis (innermost) for the current BH tile.
    @pl.when(pl.program_id(1) == 0)
    def _():
        h_ref[...] = jnp.zeros_like(h_ref)

    t_s = f_ref.shape[0]

    def step(t, h):
        ft = f_ref[t].astype(jnp.float32)          # (r_tile, 128)
        zt = z_ref[t].astype(jnp.float32)
        h = zt + ft * (h - zt)                     # == (1 - f) * z + f * h
        o_ref[t] = h.astype(o_ref.dtype)
        return h

    h_ref[...] = jax.lax.fori_loop(0, t_s, step, h_ref[...],
                                   unroll=min(8, t_s))


def f_pooling(f, z, *, seq_chunk=128, r_tile_max=16):
    """ForgetMult / f-pooling.  f, z: (batch, hidden, seq) -> (batch, hidden, seq)."""
    assert f.shape == z.shape
    B, H, S = f.shape
    N = B * H

    # ---- lane-dense layout: (B,H,S) -> (S_pad, R_pad, 128) -----------------
    R = pl.cdiv(N, _LANE)
    if R <= 8:
        r_tile = R                                   # block == full 2nd-minor dim
    else:
        r_tile = max(8, (min(r_tile_max, R) // 8) * 8)   # multiple of 8
    R_pad = pl.cdiv(R, r_tile) * r_tile
    N_pad = R_pad * _LANE

    T_S = min(seq_chunk, S)
    S_pad = pl.cdiv(S, T_S) * T_S

    # TODO(synk): callers holding (seq, batch*hidden)-contiguous activations can
    # skip these two HBM transposes (they add extra HBM traffic for a
    # memory-bound op); kept here to exactly match the module's (B,H,S) API.
    def _prep(x):
        xs = jnp.transpose(x.reshape(N, S))                      # (S, N)
        xs = jnp.pad(xs, ((0, S_pad - S), (0, N_pad - N)))
        return xs.reshape(S_pad, R_pad, _LANE)

    fs = _prep(f)
    zs = _prep(z)

    n_bh = R_pad // r_tile
    n_sc = S_pad // T_S

    block = (T_S, r_tile, _LANE)
    in_spec = pl.BlockSpec(block, lambda bh, sc: (sc, bh, 0))

    out = pl.pallas_call(
        _fpool_kernel,
        out_shape=jax.ShapeDtypeStruct((S_pad, R_pad, _LANE), f.dtype),
        grid_spec=pltpu.PrefetchScalarGridSpec(
            num_scalar_prefetch=0,
            grid=(n_bh, n_sc),                       # parallel BH outer, serial seq inner
            in_specs=[in_spec, in_spec],
            out_specs=pl.BlockSpec(block, lambda bh, sc: (sc, bh, 0)),
            scratch_shapes=[pltpu.VMEM((r_tile, _LANE), jnp.float32)],
        ),
        compiler_params=pltpu.CompilerParams(
            dimension_semantics=("parallel", "arbitrary"),
        ),
    )(fs, zs)

    # ---- back to (batch, hidden, seq) --------------------------------------
    out = out.reshape(S_pad, N_pad)[:S, :N]          # drop seq / lane padding
    return jnp.transpose(out).reshape(B, H, S)


def _reference(f, z):
    # pure-JAX reference of the same recurrence (sanity check)
    fs = jnp.transpose(f, (2, 0, 1)).astype(jnp.float32)
    zs = jnp.transpose(z, (2, 0, 1)).astype(jnp.float32)

    def step(h_prev, inp):
        ft, zt = inp
        h = (1.0 - ft) * zt + ft * h_prev
        return h, h

    h0 = jnp.zeros(fs.shape[1:], jnp.float32)
    _, hs = jax.lax.scan(step, h0, (fs, zs))
    return jnp.transpose(hs, (1, 2, 0)).astype(f.dtype)


def _make_inputs(key, B, H, S):
    kf, kz = jax.random.split(key)
    f = jax.nn.sigmoid(jax.random.normal(kf, (B, H, S), jnp.float32))
    z = jax.random.normal(kz, (B, H, S), jnp.float32)
    return f, z


if __name__ == "__main__":
    key = jax.random.PRNGKey(0)

    # small shape matching the module's forward: (batch, hidden, seq)
    B, H, S = 2, 32, 8
    f, z = _make_inputs(key, B, H, S)
    out = f_pooling(f, z)
    jax.block_until_ready(out)
    ref = _reference(f, z)
    assert out.shape == (B, H, S)
    assert jnp.allclose(out, ref, atol=1e-4, rtol=1e-4)

    # second shape exercising multiple seq chunks, BH tiles and padding paths
    B2, H2, S2 = 4, 640, 300
    f2, z2 = _make_inputs(jax.random.PRNGKey(1), B2, H2, S2)
    out2 = f_pooling(f2, z2)
    jax.block_until_ready(out2)
    ref2 = _reference(f2, z2)
    assert out2.shape == (B2, H2, S2)
    assert jnp.allclose(out2, ref2, atol=1e-4, rtol=1e-4)

    print("KERNEL_OK")
</pallas_src>

<mosaic_0001>
module attributes {stable_mosaic.version = 11 : i64} {
  func.func @_fpool_kernel(%arg0: i32, %arg1: i32, %arg2: memref<8x1x128xf32, #tpu.memory_space<vmem>>, %arg3: memref<8x1x128xf32, #tpu.memory_space<vmem>>, %arg4: memref<8x1x128xf32, #tpu.memory_space<vmem>>, %arg5: memref<1x128xf32, #tpu.memory_space<vmem>>) attributes {dimension_semantics = [#tpu.dimension_semantics<parallel>, #tpu.dimension_semantics<arbitrary>], iteration_bounds = array<i64: 1, 1>, scalar_prefetch = 0 : i64, scratch_operands = 1 : i64, tpu.core_type = #tpu.core_type<tc>, window_params = [{transform_indices = @transform_0, window_bounds = array<i64: 8, 1, 128>}, {transform_indices = @transform_1, window_bounds = array<i64: 8, 1, 128>}, {transform_indices = @transform_2, window_bounds = array<i64: 8, 1, 128>}]} {
    %c0_i32 = arith.constant 0 : i32
    %0 = arith.cmpi eq, %arg1, %c0_i32 : i32
    %1 = arith.extui %0 : i1 to i32
    %c0_i32_0 = arith.constant 0 : i32
    %2 = arith.cmpi ne, %1, %c0_i32_0 : i32
    scf.if %2 {
      %cst = arith.constant 0.000000e+00 : f32
      %109 = vector.broadcast %cst : f32 to vector<1x128xf32>
      %c0_53 = arith.constant 0 : index
      %c0_54 = arith.constant 0 : index
      %110 = vector.load %arg5[%c0_53, %c0_54] : memref<1x128xf32, #tpu.memory_space<vmem>>, vector<1x128xf32>
      tpu.vector_store %arg5[%c0_53, %c0_54], %109 {strides = array<i32>} : memref<1x128xf32, #tpu.memory_space<vmem>>, vector<1x128xf32>,
    } else {
    }
    %c0 = arith.constant 0 : index
    %c0_1 = arith.constant 0 : index
    %3 = vector.load %arg5[%c0, %c0_1] : memref<1x128xf32, #tpu.memory_space<vmem>>, vector<1x128xf32>
    %c0_i32_2 = arith.constant 0 : i32
    %4 = arith.index_cast %c0_i32_2 : i32 to index
    %c0_3 = arith.constant 0 : index
    %c0_4 = arith.constant 0 : index
    %5 = vector.load %arg2[%4, %c0_3, %c0_4] : memref<8x1x128xf32, #tpu.memory_space<vmem>>, vector<1x1x128xf32>
    %6 = vector.shape_cast %5 : vector<1x1x128xf32> to vector<1x128xf32>
    %7 = arith.index_cast %c0_i32_2 : i32 to index
    %c0_5 = arith.constant 0 : index
    %c0_6 = arith.constant 0 : index
    %8 = vector.load %arg3[%7, %c0_5, %c0_6] : memref<8x1x128xf32, #tpu.memory_space<vmem>>, vector<1x1x128xf32>
    %9 = vector.shape_cast %8 : vector<1x1x128xf32> to vector<1x128xf32>
    %10 = arith.subf %3, %9 : vector<1x128xf32>
    %11 = arith.mulf %6, %10 : vector<1x128xf32>
    %12 = arith.addf %9, %11 : vector<1x128xf32>
    %13 = arith.index_cast %c0_i32_2 : i32 to index
    %c0_7 = arith.constant 0 : index
    %c0_8 = arith.constant 0 : index
    %14 = vector.load %arg4[%13, %c0_7, %c0_8] : memref<8x1x128xf32, #tpu.memory_space<vmem>>, vector<1x1x128xf32>
    %15 = vector.shape_cast %14 : vector<1x1x128xf32> to vector<1x128xf32>
    %16 = vector.shape_cast %12 : vector<1x128xf32> to vector<1x1x128xf32>
    tpu.vector_store %arg4[%13, %c0_7, %c0_8], %16 {strides = array<i32>} : memref<8x1x128xf32, #tpu.memory_space<vmem>>, vector<1x1x128xf32>,
    %c1_i32 = arith.constant 1 : i32
    %17 = arith.index_cast %c1_i32 : i32 to index
    %c0_9 = arith.constant 0 : index
    %c0_10 = arith.constant 0 : index
    %18 = vector.load %arg2[%17, %c0_9, %c0_10] : memref<8x1x128xf32, #tpu.memory_space<vmem>>, vector<1x1x128xf32>
    %19 = vector.shape_cast %18 : vector<1x1x128xf32> to vector<1x128xf32>
    %20 = arith.index_cast %c1_i32 : i32 to index
    %c0_11 = arith.constant 0 : index
    %c0_12 = arith.constant 0 : index
    %21 = vector.load %arg3[%20, %c0_11, %c0_12] : memref<8x1x128xf32, #tpu.memory_space<vmem>>, vector<1x1x128xf32>
    %22 = vector.shape_cast %21 : vector<1x1x128xf32> to vector<1x128xf32>
    %23 = arith.subf %12, %22 : vector<1x128xf32>
    %24 = arith.mulf %19, %23 : vector<1x128xf32>
    %25 = arith.addf %22, %24 : vector<1x128xf32>
    %26 = arith.index_cast %c1_i32 : i32 to index
    %c0_13 = arith.constant 0 : index
    %c0_14 = arith.constant 0 : index
    %27 = vector.load %arg4[%26, %c0_13, %c0_14] : memref<8x1x128xf32, #tpu.memory_space<vmem>>, vector<1x1x128xf32>
    %28 = vector.shape_cast %27 : vector<1x1x128xf32> to vector<1x128xf32>
    %29 = vector.shape_cast %25 : vector<1x128xf32> to vector<1x1x128xf32>
    tpu.vector_store %arg4[%26, %c0_13, %c0_14], %29 {strides = array<i32>} : memref<8x1x128xf32, #tpu.memory_space<vmem>>, vector<1x1x128xf32>,
    %c2_i32 = arith.constant 2 : i32
    %30 = arith.index_cast %c2_i32 : i32 to index
    %c0_15 = arith.constant 0 : index
    %c0_16 = arith.constant 0 : index
    %31 = vector.load %arg2[%30, %c0_15, %c0_16] : memref<8x1x128xf32, #tpu.memory_space<vmem>>, vector<1x1x128xf32>
    %32 = vector.shape_cast %31 : vector<1x1x128xf32> to vector<1x128xf32>
    %33 = arith.index_cast %c2_i32 : i32 to index
    %c0_17 = arith.constant 0 : index
    %c0_18 = arith.constant 0 : index
    %34 = vector.load %arg3[%33, %c0_17, %c0_18] : memref<8x1x128xf32, #tpu.memory_space<vmem>>, vector<1x1x128xf32>
    %35 = vector.shape_cast %34 : vector<1x1x128xf32> to vector<1x128xf32>
    %36 = arith.subf %25, %35 : vector<1x128xf32>
    %37 = arith.mulf %32, %36 : vector<1x128xf32>
    %38 = arith.addf %35, %37 : vector<1x128xf32>
    %39 = arith.index_cast %c2_i32 : i32 to index
    %c0_19 = arith.constant 0 : index
    %c0_20 = arith.constant 0 : index
    %40 = vector.load %arg4[%39, %c0_19, %c0_20] : memref<8x1x128xf32, #tpu.memory_space<vmem>>, vector<1x1x128xf32>
    %41 = vector.shape_cast %40 : vector<1x1x128xf32> to vector<1x128xf32>
    %42 = vector.shape_cast %38 : vector<1x128xf32> to vector<1x1x128xf32>
    tpu.vector_store %arg4[%39, %c0_19, %c0_20], %42 {strides = array<i32>} : memref<8x1x128xf32, #tpu.memory_space<vmem>>, vector<1x1x128xf32>,
    %c3_i32 = arith.constant 3 : i32
    %43 = arith.index_cast %c3_i32 : i32 to index
    %c0_21 = arith.constant 0 : index
    %c0_22 = arith.constant 0 : index
    %44 = vector.load %arg2[%43, %c0_21, %c0_22] : memref<8x1x128xf32, #tpu.memory_space<vmem>>, vector<1x1x128xf32>
    %45 = vector.shape_cast %44 : vector<1x1x128xf32> to vector<1x128xf32>
    %46 = arith.index_cast %c3_i32 : i32 to index
    %c0_23 = arith.constant 0 : index
    %c0_24 = arith.constant 0 : index
    %47 = vector.load %arg3[%46, %c0_23, %c0_24] : memref<8x1x128xf32, #tpu.memory_space<vmem>>, vector<1x1x128xf32>
    %48 = vector.shape_cast %47 : vector<1x1x128xf32> to vector<1x128xf32>
    %49 = arith.subf %38, %48 : vector<1x128xf32>
    %50 = arith.mulf %45, %49 : vector<1x128xf32>
    %51 = arith.addf %48, %50 : vector<1x128xf32>
    %52 = arith.index_cast %c3_i32 : i32 to index
    %c0_25 = arith.constant 0 : index
    %c0_26 = arith.constant 0 : index
    %53 = vector.load %arg4[%52, %c0_25, %c0_26] : memref<8x1x128xf32, #tpu.memory_space<vmem>>, vector<1x1x128xf32>
    %54 = vector.shape_cast %53 : vector<1x1x128xf32> to vector<1x128xf32>
    %55 = vector.shape_cast %51 : vector<1x128xf32> to vector<1x1x128xf32>
    tpu.vector_store %arg4[%52, %c0_25, %c0_26], %55 {strides = array<i32>} : memref<8x1x128xf32, #tpu.memory_space<vmem>>, vector<1x1x128xf32>,
    %c4_i32 = arith.constant 4 : i32
    %56 = arith.index_cast %c4_i32 : i32 to index
    %c0_27 = arith.constant 0 : index
    %c0_28 = arith.constant 0 : index
    %57 = vector.load %arg2[%56, %c0_27, %c0_28] : memref<8x1x128xf32, #tpu.memory_space<vmem>>, vector<1x1x128xf32>
    %58 = vector.shape_cast %57 : vector<1x1x128xf32> to vector<1x128xf32>
    %59 = arith.index_cast %c4_i32 : i32 to index
    %c0_29 = arith.constant 0 : index
    %c0_30 = arith.constant 0 : index
    %60 = vector.load %arg3[%59, %c0_29, %c0_30] : memref<8x1x128xf32, #tpu.memory_space<vmem>>, vector<1x1x128xf32>
    %61 = vector.shape_cast %60 : vector<1x1x128xf32> to vector<1x128xf32>
    %62 = arith.subf %51, %61 : vector<1x128xf32>
    %63 = arith.mulf %58, %62 : vector<1x128xf32>
    %64 = arith.addf %61, %63 : vector<1x128xf32>
    %65 = arith.index_cast %c4_i32 : i32 to index
    %c0_31 = arith.constant 0 : index
    %c0_32 = arith.constant 0 : index
    %66 = vector.load %arg4[%65, %c0_31, %c0_32] : memref<8x1x128xf32, #tpu.memory_space<vmem>>, vector<1x1x128xf32>
    %67 = vector.shape_cast %66 : vector<1x1x128xf32> to vector<1x128xf32>
    %68 = vector.shape_cast %64 : vector<1x128xf32> to vector<1x1x128xf32>
    tpu.vector_store %arg4[%65, %c0_31, %c0_32], %68 {strides = array<i32>} : memref<8x1x128xf32, #tpu.memory_space<vmem>>, vector<1x1x128xf32>,
    %c5_i32 = arith.constant 5 : i32
    %69 = arith.index_cast %c5_i32 : i32 to index
    %c0_33 = arith.constant 0 : index
    %c0_34 = arith.constant 0 : index
    %70 = vector.load %arg2[%69, %c0_33, %c0_34] : memref<8x1x128xf32, #tpu.memory_space<vmem>>, vector<1x1x128xf32>
    %71 = vector.shape_cast %70 : vector<1x1x128xf32> to vector<1x128xf32>
    %72 = arith.index_cast %c5_i32 : i32 to index
    %c0_35 = arith.constant 0 : index
    %c0_36 = arith.constant 0 : index
    %73 = vector.load %arg3[%72, %c0_35, %c0_36] : memref<8x1x128xf32, #tpu.memory_space<vmem>>, vector<1x1x128xf32>
    %74 = vector.shape_cast %73 : vector<1x1x128xf32> to vector<1x128xf32>
    %75 = arith.subf %64, %74 : vector<1x128xf32>
    %76 = arith.mulf %71, %75 : vector<1x128xf32>
    %77 = arith.addf %74, %76 : vector<1x128xf32>
    %78 = arith.index_cast %c5_i32 : i32 to index
    %c0_37 = arith.constant 0 : index
    %c0_38 = arith.constant 0 : index
    %79 = vector.load %arg4[%78, %c0_37, %c0_38] : memref<8x1x128xf32, #tpu.memory_space<vmem>>, vector<1x1x128xf32>
    %80 = vector.shape_cast %79 : vector<1x1x128xf32> to vector<1x128xf32>
    %81 = vector.shape_cast %77 : vector<1x128xf32> to vector<1x1x128xf32>
    tpu.vector_store %arg4[%78, %c0_37, %c0_38], %81 {strides = array<i32>} : memref<8x1x128xf32, #tpu.memory_space<vmem>>, vector<1x1x128xf32>,
    %c6_i32 = arith.constant 6 : i32
    %82 = arith.index_cast %c6_i32 : i32 to index
    %c0_39 = arith.constant 0 : index
    %c0_40 = arith.constant 0 : index
    %83 = vector.load %arg2[%82, %c0_39, %c0_40] : memref<8x1x128xf32, #tpu.memory_space<vmem>>, vector<1x1x128xf32>
    %84 = vector.shape_cast %83 : vector<1x1x128xf32> to vector<1x128xf32>
    %85 = arith.index_cast %c6_i32 : i32 to index
    %c0_41 = arith.constant 0 : index
    %c0_42 = arith.constant 0 : index
    %86 = vector.load %arg3[%85, %c0_41, %c0_42] : memref<8x1x128xf32, #tpu.memory_space<vmem>>, vector<1x1x128xf32>
    %87 = vector.shape_cast %86 : vector<1x1x128xf32> to vector<1x128xf32>
    %88 = arith.subf %77, %87 : vector<1x128xf32>
    %89 = arith.mulf %84, %88 : vector<1x128xf32>
    %90 = arith.addf %87, %89 : vector<1x128xf32>
    %91 = arith.index_cast %c6_i32 : i32 to index
    %c0_43 = arith.constant 0 : index
    %c0_44 = arith.constant 0 : index
    %92 = vector.load %arg4[%91, %c0_43, %c0_44] : memref<8x1x128xf32, #tpu.memory_space<vmem>>, vector<1x1x128xf32>
    %93 = vector.shape_cast %92 : vector<1x1x128xf32> to vector<1x128xf32>
    %94 = vector.shape_cast %90 : vector<1x128xf32> to vector<1x1x128xf32>
    tpu.vector_store %arg4[%91, %c0_43, %c0_44], %94 {strides = array<i32>} : memref<8x1x128xf32, #tpu.memory_space<vmem>>, vector<1x1x128xf32>,
    %c7_i32 = arith.constant 7 : i32
    %95 = arith.index_cast %c7_i32 : i32 to index
    %c0_45 = arith.constant 0 : index
    %c0_46 = arith.constant 0 : index
    %96 = vector.load %arg2[%95, %c0_45, %c0_46] : memref<8x1x128xf32, #tpu.memory_space<vmem>>, vector<1x1x128xf32>
    %97 = vector.shape_cast %96 : vector<1x1x128xf32> to vector<1x128xf32>
    %98 = arith.index_cast %c7_i32 : i32 to index
    %c0_47 = arith.constant 0 : index
    %c0_48 = arith.constant 0 : index
    %99 = vector.load %arg3[%98, %c0_47, %c0_48] : memref<8x1x128xf32, #tpu.memory_space<vmem>>, vector<1x1x128xf32>
    %100 = vector.shape_cast %99 : vector<1x1x128xf32> to vector<1x128xf32>
    %101 = arith.subf %90, %100 : vector<1x128xf32>
    %102 = arith.mulf %97, %101 : vector<1x128xf32>
    %103 = arith.addf %100, %102 : vector<1x128xf32>
    %104 = arith.index_cast %c7_i32 : i32 to index
    %c0_49 = arith.constant 0 : index
    %c0_50 = arith.constant 0 : index
    %105 = vector.load %arg4[%104, %c0_49, %c0_50] : memref<8x1x128xf32, #tpu.memory_space<vmem>>, vector<1x1x128xf32>
    %106 = vector.shape_cast %105 : vector<1x1x128xf32> to vector<1x128xf32>
    %107 = vector.shape_cast %103 : vector<1x128xf32> to vector<1x1x128xf32>
    tpu.vector_store %arg4[%104, %c0_49, %c0_50], %107 {strides = array<i32>} : memref<8x1x128xf32, #tpu.memory_space<vmem>>, vector<1x1x128xf32>,
    %c8_i32 = arith.constant 8 : i32
    %c0_51 = arith.constant 0 : index
    %c0_52 = arith.constant 0 : index
    %108 = vector.load %arg5[%c0_51, %c0_52] : memref<1x128xf32, #tpu.memory_space<vmem>>, vector<1x128xf32>
    tpu.vector_store %arg5[%c0_51, %c0_52], %103 {strides = array<i32>} : memref<1x128xf32, #tpu.memory_space<vmem>>, vector<1x128xf32>,
    return
  }
  func.func @transform_0(%arg0: i32, %arg1: i32) -> (i32, i32, i32) {
    %c0_i32 = arith.constant 0 : i32
    %c0_i32_0 = arith.constant 0 : i32
    return %arg1, %arg0, %c0_i32 : i32, i32, i32
  }
  func.func @transform_1(%arg0: i32, %arg1: i32) -> (i32, i32, i32) {
    %c0_i32 = arith.constant 0 : i32
    %c0_i32_0 = arith.constant 0 : i32
    return %arg1, %arg0, %c0_i32 : i32, i32, i32
  }
  func.func @transform_2(%arg0: i32, %arg1: i32) -> (i32, i32, i32) {
    %c0_i32 = arith.constant 0 : i32
    %c0_i32_0 = arith.constant 0 : i32
    return %arg1, %arg0, %c0_i32 : i32, i32, i32
  }
}

</mosaic_0001>

<bundles_post_ra>
// kernel: tpu_custom_call.1
= control target key start
LH: loop header
LB: loop body
LE: loop exit
PB: predicated region body
PF: predicated region fallthrough
CT: control target
= control target key end

     0   :  { %7 = vsyncpa [#allocation4], 0  ;;  %s263_s0 = inlined_call_operand.hbm [shape: f32[8,1,128], index: 0, kind: input, shape index: {}]   ;;  %s264_s1 = inlined_call_operand.hbm [shape: f32[8,1,128], index: 1, kind: input, shape index: {}]   ;;  %s265_s2 = inlined_call_operand.hbm [shape: f32[8,1,128], index: 2, kind: output, shape index: {}]  }
   0x1   :  { %8 = vsyncpa [#allocation7], 0 }
   0x2   :  { %9 = vsyncpa [#allocation5], 0  ;;  %s14_s11 = sshll.u32 %s263_s0, 4  ;;  %s224_s12 = smov [#allocation3]   ;;  %s15_s11 = int_to_ptr.hbm [resolvable:$true] %s14_s11 }
   0x3   :  { %s16_s13 = sshll.u32 %s224_s12, 4  ;;  %s27_s16 = sshll.u32 %s264_s1, 4  ;;  %s17_s13 = int_to_ptr.vmem [resolvable:$true] %s16_s13  ;;  %s28_s16 = int_to_ptr.hbm [resolvable:$true] %s27_s16 }
   0x4   :  { %s225_s17 = smov 16   ;;  %s226_s18 = smov 1  }
   0x5   :  { %22 = dma.hbm_to_vmem [thread:$0]  %s15_s11, 128, %s17_s13, [#allocation4], %s225_s17, %s225_s17, %s226_s18  }
   0x6   :  { %s227_s19 = smov [#allocation6]  }
   0x7   :  { %s29_s20 = sshll.u32 %s227_s19, 4  ;;  %s30_s20 = int_to_ptr.vmem [resolvable:$true] %s29_s20 }
   0x8   :  { %35 = dma.hbm_to_vmem [thread:$0]  %s28_s16, 128, %s30_s20, [#allocation7], %s225_s17, %s225_s17, %s226_s18  }
   0x9   :  { %218 = dma.done.wait [#allocation4], 128  }
   0xa   :  { %219 = vsyncadd [#allocation4], 4294967168 }
   0xb   :  { %220 = dma.done.wait [#allocation7], 128  }
   0xc   :  { %221 = vsyncadd [#allocation7], 4294967168  ;;  %v228_v0 = vmov 0.0   ;;  %v51_v1 = vld [vmem:[#allocation6] sm:$0x1]  ;;  %s229_s0 = smov [#allocation8]  }
   0xd   :  { %48 = vst [vmem:[#allocation2] sm:$0x1] %v228_v0  ;;  %v50_v3 = vld [vmem:[#allocation3] sm:$0x1]  ;;  %v59_v6 = vld [vmem:[#allocation6 + $0x1] sm:$0x1] }
   0xe   :  { %v57_v8 = vld [vmem:[#allocation3 + $0x1] sm:$0x1]  ;;  %v68_v11 = vld [vmem:[#allocation6 + $0x2] sm:$0x1]  ;;  %v66_v13 = vld [vmem:[#allocation3 + $0x2] sm:$0x1] }
   0xf   :  { %v77_v16 = vld [vmem:[#allocation6 + $0x3] sm:$0x1]  ;;  %v75_v18 = vld [vmem:[#allocation3 + $0x3] sm:$0x1]  ;;  %v86_v21 = vld [vmem:[#allocation6 + $0x4] sm:$0x1] }
  0x10   :  { %v84_v23 = vld [vmem:[#allocation3 + $0x4] sm:$0x1]  ;;  %v95_v26 = vld [vmem:[#allocation6 + $0x5] sm:$0x1]  ;;  %v93_v28 = vld [vmem:[#allocation3 + $0x5] sm:$0x1] }
  0x11   :  { %v104_v31 = vld [vmem:[#allocation6 + $0x6] sm:$0x1]  ;;  %v102_v33 = vld [vmem:[#allocation3 + $0x6] sm:$0x1]  ;;  %v113_v36 = vld [vmem:[#allocation6 + $0x7] sm:$0x1] }
  0x12   :  { %v111_v38 = vld [vmem:[#allocation3 + $0x7] sm:$0x1]  ;;  %s124_s1 = sshll.u32 %s229_s0, 4  ;;  %s126_s23 = sshll.u32 %s265_s2, 4  ;;  %s125_s1 = int_to_ptr.vmem [resolvable:$true] %s124_s1  ;;  %s127_s23 = int_to_ptr.hbm [resolvable:$true] %s126_s23 }
  0x14   :  { %v49_v2 = vld [vmem:[#allocation2] sm:$0x1] }
  0x15   :  { %v52_v4 = vsub.f32 %v49_v2, %v51_v1 }
  0x17   :  { %v53_v5 = vmul.f32 %v52_v4, %v50_v3 }
  0x19   :  { %v54_v7 = vadd.f32 %v53_v5, %v51_v1 }
  0x1b   :  { %55 = vst [vmem:[#allocation8] sm:$0x1] %v54_v7  ;;  %v60_v9 = vsub.f32 %v54_v7, %v59_v6 }
  0x1d   :  { %v61_v10 = vmul.f32 %v60_v9, %v57_v8 }
  0x1f   :  { %v62_v12 = vadd.f32 %v61_v10, %v59_v6 }
  0x21   :  { %64 = vst [vmem:[#allocation8 + $0x1] sm:$0x1] %v62_v12  ;;  %v69_v14 = vsub.f32 %v62_v12, %v68_v11 }
  0x23   :  { %v70_v15 = vmul.f32 %v69_v14, %v66_v13 }
  0x25   :  { %v71_v17 = vadd.f32 %v70_v15, %v68_v11 }
  0x27   :  { %73 = vst [vmem:[#allocation8 + $0x2] sm:$0x1] %v71_v17  ;;  %v78_v19 = vsub.f32 %v71_v17, %v77_v16 }
  0x29   :  { %v79_v20 = vmul.f32 %v78_v19, %v75_v18 }
  0x2b   :  { %v80_v22 = vadd.f32 %v79_v20, %v77_v16 }
  0x2d   :  { %82 = vst [vmem:[#allocation8 + $0x3] sm:$0x1] %v80_v22  ;;  %v87_v24 = vsub.f32 %v80_v22, %v86_v21 }
  0x2f   :  { %v88_v25 = vmul.f32 %v87_v24, %v84_v23 }
  0x31   :  { %v89_v27 = vadd.f32 %v88_v25, %v86_v21 }
  0x33   :  { %91 = vst [vmem:[#allocation8 + $0x4] sm:$0x1] %v89_v27  ;;  %v96_v29 = vsub.f32 %v89_v27, %v95_v26 }
  0x35   :  { %v97_v30 = vmul.f32 %v96_v29, %v93_v28 }
  0x37   :  { %v98_v32 = vadd.f32 %v97_v30, %v95_v26 }
  0x39   :  { %100 = vst [vmem:[#allocation8 + $0x5] sm:$0x1] %v98_v32  ;;  %v105_v34 = vsub.f32 %v98_v32, %v104_v31 }
  0x3b   :  { %v106_v35 = vmul.f32 %v105_v34, %v102_v33 }
  0x3d   :  { %v107_v37 = vadd.f32 %v106_v35, %v104_v31 }
  0x3f   :  { %109 = vst [vmem:[#allocation8 + $0x6] sm:$0x1] %v107_v37  ;;  %v114_v39 = vsub.f32 %v107_v37, %v113_v36 }
  0x41   :  { %v115_v40 = vmul.f32 %v114_v39, %v111_v38 }
  0x43   :  { %v116_v41 = vadd.f32 %v115_v40, %v113_v36 }
  0x45   :  { %118 = vst [vmem:[#allocation8 + $0x7] sm:$0x1] %v116_v41 }
  0x46   :  { %119 = vst [vmem:[#allocation2] sm:$0x1] %v116_v41  ;;  %132 = dma.vmem_to_hbm [thread:$0]  %s125_s1, 128, %s127_s23, [#allocation5], %s225_s17, %s225_s17, %s226_s18  }
  0x47   :  { %222 = dma.done.wait [#allocation5], 128  }
  0x48   :  { %223 = vsyncadd [#allocation5], 4294967168 }
  0x49   :  { %137 = vsyncpa [#allocation4], 1 }
  0x4a   :  { %138 = vsyncpa [#allocation7], 1 }
  0x4b   :  { %139 = vsyncpa [#allocation5], 1 }

</bundles_post_ra>
